<compile_context>
chip_gen: v5e
topology: v5e:2x2
jax: 0.10.0
libtpu: 0.0.40
codegen_flags: <defaults>
</compile_context>

<pallas_src>
import functools

import jax
import jax.numpy as jnp
from jax.experimental import pallas as pl
from jax.experimental.pallas import tpu as pltpu


# ----------------------------------------------------------------------------- #
# Pallas kernel: one vectorized step per (tb, C) batch tile.
# ----------------------------------------------------------------------------- #
def _ols_kernel(logits_ref, sup_ref, lab_ref, out_ref, *, alpha, batch):
    # logits_ref: [tb, C]  input dtype (VMEM block)
    # sup_ref:    [tb, C]  f32  (wrapper-gathered rows of supervise.T)
    # lab_ref:    [tb, 1]  int32
    # out_ref:    [tb, 1]  f32  (per-row masked loss contribution)
    i = pl.program_id(0)
    tb, c = logits_ref.shape

    # Numerically-stable log_softmax, computed in vregs and consumed immediately.
    x = logits_ref[...].astype(jnp.float32)                     # (tb, C)
    m = jnp.max(x, axis=-1, keepdims=True)
    z = x - m
    lse = jnp.log(jnp.sum(jnp.exp(z), axis=-1, keepdims=True))
    neg_logp = lse - z                                          # -log_softmax(x), (tb, C)

    sup = sup_ref[...]                                          # (tb, C) f32
    y = lab_ref[...]                                            # (tb, 1) int32
    cls = jax.lax.broadcasted_iota(jnp.int32, (tb, c), 1)
    onehot = jnp.where(cls == y, 1.0, 0.0)                      # vectorized over the tile

    # Fuse hard + soft into a single multiply-reduce pass per tile:
    #   alpha * (-log_p[b, y[b]]) + (1 - alpha) * sum_c sup[b, c] * (-log_p[b, c])
    w = (1.0 - alpha) * sup + alpha * onehot
    row_loss = jnp.sum(w * neg_logp, axis=-1, keepdims=True)    # (tb, 1)

    # Mask padded rows (row >= batch) so the wrapper can just sum everything.
    rows = i * tb + jax.lax.broadcasted_iota(jnp.int32, (tb, 1), 0)
    out_ref[...] = jnp.where(rows < batch, row_loss, 0.0)


# ----------------------------------------------------------------------------- #
# Wrapper
# ----------------------------------------------------------------------------- #
def ols_forward(logits, labels, supervise, alpha, *, tb=512):
    """Eval/forward semantics of OnlineLabelSmoothing.forward (returns scalar loss).

    `logits` may be bf16 or f32 (the upcast happens inside the kernel).
    `tb` is the requested batch tile; it is rounded to a multiple of 16 and auto-capped
    so the double-buffered streams fit comfortably in VMEM on all generations.
    """
    B, C = logits.shape
    itemsize = jnp.dtype(logits.dtype).itemsize

    # VMEM budget per tile row: double-buffered logits stream + double-buffered f32
    # sup_rows stream (+ labels/output, negligible).  Keep total under ~24 MiB so the
    # default scoped limit works everywhere and v7x (64 MiB physical) has headroom.
    bytes_per_row = 2 * C * (itemsize + 4) + 4 * 4
    tb_cap = max(16, ((24 << 20) // bytes_per_row) // 16 * 16)
    tb = int(min(int(tb), tb_cap))
    tb = max(16, min(tb, int(pl.cdiv(B, 16)) * 16))   # don't pad a tiny batch to a huge tile
    tb = (tb // 16) * 16

    b_pad = int(pl.cdiv(B, tb)) * tb
    labels = labels.astype(jnp.int32)
    if b_pad != B:
        logits = jnp.pad(logits, ((0, b_pad - B), (0, 0)))
        labels = jnp.pad(labels, (0, b_pad - B))

    # Gather the per-sample soft-label rows ONCE in XLA: sup_rows[b] = supervise.T[y[b]].
    sup_rows = jnp.take(supervise.T.astype(jnp.float32), labels, axis=0)   # (b_pad, C)
    labels_2d = labels[:, None]                                            # (b_pad, 1)

    n_tiles = b_pad // tb
    kernel = functools.partial(_ols_kernel, alpha=float(alpha), batch=int(B))

    vmem_needed = tb * bytes_per_row + (1 << 20)
    vmem_limit = int(min(max(2 * vmem_needed, 32 << 20), 48 << 20))

    row_loss = pl.pallas_call(
        kernel,
        out_shape=jax.ShapeDtypeStruct((b_pad, 1), jnp.float32),
        grid=(n_tiles,),
        in_specs=[
            pl.BlockSpec((tb, C), lambda i: (i, 0)),   # logits tile
            pl.BlockSpec((tb, C), lambda i: (i, 0)),   # gathered soft-label rows (f32)
            pl.BlockSpec((tb, 1), lambda i: (i, 0)),   # labels (for vectorized one-hot)
        ],
        out_specs=pl.BlockSpec((tb, 1), lambda i: (i, 0)),
        compiler_params=pltpu.CompilerParams(
            dimension_semantics=("parallel",),          # each tile writes its own block
            vmem_limit_bytes=vmem_limit,
        ),
    )(logits, sup_rows, labels_2d)

    # Final reduction + 1/batch scale done once here (padded rows already masked to 0).
    return jnp.sum(row_loss) / B


# ----------------------------------------------------------------------------- #
# Training-mode buffer update (`step`): data-dependent scatter-add kept in JAX.
# TODO(synk): `update.index_add_` / `idx_count.index_add_` scatter has no clean
#             Pallas tile pattern; done functionally in plain JAX here.
# ----------------------------------------------------------------------------- #
def ols_step(probs, labels, update, idx_count):
    pred = jnp.argmax(probs, axis=-1)
    correct = (pred == labels).astype(jnp.float32)
    oh = jax.nn.one_hot(pred, probs.shape[-1], dtype=jnp.float32) * correct[:, None]
    new_update = update + probs.T @ oh            # column j accumulates probs of correct preds == j
    new_idx_count = idx_count + jnp.sum(oh, axis=0)
    return new_update, new_idx_count


# ----------------------------------------------------------------------------- #
# Pure-JAX reference for correctness checking.
# ----------------------------------------------------------------------------- #
def ols_forward_ref(logits, labels, supervise, alpha):
    log_p = jax.nn.log_softmax(logits.astype(jnp.float32), axis=-1)
    true_dist = supervise[:, labels].swapaxes(-1, -2)           # [B, C]
    soft = jnp.mean(jnp.sum(-true_dist * log_p, axis=-1))
    hard = jnp.mean(-jnp.take_along_axis(log_p, labels[:, None], axis=-1)[:, 0])
    return alpha * hard + (1.0 - alpha) * soft


if __name__ == "__main__":
    alpha = 0.5
    n_classes = 128
    smoothing = 0.1

    # supervise buffer as initialized by the module: off-diag = s/(C-1), diag = 1-s
    off = smoothing / (n_classes - 1)
    supervise = jnp.full((n_classes, n_classes), off, dtype=jnp.float32)
    supervise = supervise.at[jnp.arange(n_classes), jnp.arange(n_classes)].set(1.0 - smoothing)

    key = jax.random.PRNGKey(0)
    k_logits, k_labels, k_sup, k_logits2, k_labels2 = jax.random.split(key, 5)

    # 1) f32 logits, batch NOT a multiple of the tile (exercises in-kernel masking),
    #    initial symmetric supervise matrix.
    batch = 12
    logits = jax.random.normal(k_logits, (batch, n_classes), dtype=jnp.float32)
    labels = jax.random.randint(k_labels, (batch,), 0, n_classes, dtype=jnp.int32)
    loss = jax.block_until_ready(ols_forward(logits, labels, supervise, alpha))
    loss_ref = jax.block_until_ready(ols_forward_ref(logits, labels, supervise, alpha))
    assert jnp.allclose(loss, loss_ref, atol=1e-5, rtol=1e-5), (loss, loss_ref)

    # 2) multi-tile batch, bf16 logits (in-kernel upcast), non-symmetric
    #    (post-next_epoch-style) supervise matrix — catches transpose/gather bugs.
    batch2 = 40
    supervise2 = jax.nn.softmax(jax.random.normal(k_sup, (n_classes, n_classes)), axis=0)
    logits2 = jax.random.normal(k_logits2, (batch2, n_classes), dtype=jnp.float32)
    labels2 = jax.random.randint(k_labels2, (batch2,), 0, n_classes, dtype=jnp.int32)
    logits2_bf16 = logits2.astype(jnp.bfloat16)
    loss2 = jax.block_until_ready(ols_forward(logits2_bf16, labels2, supervise2, alpha, tb=16))
    loss2_ref = jax.block_until_ready(
        ols_forward_ref(logits2_bf16.astype(jnp.float32), labels2, supervise2, alpha))
    assert jnp.allclose(loss2, loss2_ref, atol=1e-4, rtol=1e-4), (loss2, loss2_ref)

    # Exercise the (plain-JAX) training-mode buffer update once as well.
    update = jnp.zeros((n_classes, n_classes), jnp.float32)
    idx_count = jnp.zeros((n_classes,), jnp.float32)
    probs = jax.nn.softmax(logits, axis=-1)
    update, idx_count = jax.block_until_ready(ols_step(probs, labels, update, idx_count))

    print("KERNEL_OK")
</pallas_src>

<mosaic_0001>
module attributes {stable_mosaic.version = 11 : i64} {
  func.func @_ols_kernel(%arg0: i32, %arg1: memref<16x128xf32, #tpu.memory_space<vmem>>, %arg2: memref<16x128xf32, #tpu.memory_space<vmem>>, %arg3: memref<16x1xi32, #tpu.memory_space<vmem>>, %arg4: memref<16x1xf32, #tpu.memory_space<vmem>>) attributes {dimension_semantics = [#tpu.dimension_semantics<parallel>], iteration_bounds = array<i64: 1>, scalar_prefetch = 0 : i64, scratch_operands = 0 : i64, tpu.core_type = #tpu.core_type<tc>, window_params = [{transform_indices = @transform_0, window_bounds = array<i64: 16, 128>}, {transform_indices = @transform_1, window_bounds = array<i64: 16, 128>}, {transform_indices = @transform_2, window_bounds = array<i64: 16, 1>}, {transform_indices = @transform_3, window_bounds = array<i64: 16, 1>}]} {
    %c0 = arith.constant 0 : index
    %c0_0 = arith.constant 0 : index
    %0 = vector.load %arg1[%c0, %c0_0] : memref<16x128xf32, #tpu.memory_space<vmem>>, vector<16x128xf32>
    %cst = arith.constant dense<0xFF800000> : vector<16xf32>
    %1 = vector.multi_reduction <maximumf>, %0, %cst [1] : vector<16x128xf32> to vector<16xf32>
    %2 = vector.shape_cast %1 : vector<16xf32> to vector<16x1xf32>
    %3 = vector.broadcast %2 : vector<16x1xf32> to vector<16x128xf32>
    %4 = arith.subf %0, %3 : vector<16x128xf32>
    %5 = math.exp %4 : vector<16x128xf32>
    %cst_1 = arith.constant dense<0.000000e+00> : vector<16xf32>
    %6 = vector.multi_reduction <add>, %5, %cst_1 [1] : vector<16x128xf32> to vector<16xf32>
    %7 = vector.shape_cast %6 : vector<16xf32> to vector<16x1xf32>
    %8 = math.log %7 : vector<16x1xf32>
    %9 = vector.broadcast %8 : vector<16x1xf32> to vector<16x128xf32>
    %10 = arith.subf %9, %4 : vector<16x128xf32>
    %c0_2 = arith.constant 0 : index
    %c0_3 = arith.constant 0 : index
    %11 = vector.load %arg2[%c0_2, %c0_3] : memref<16x128xf32, #tpu.memory_space<vmem>>, vector<16x128xf32>
    %c0_4 = arith.constant 0 : index
    %c0_5 = arith.constant 0 : index
    %12 = vector.load %arg3[%c0_4, %c0_5] : memref<16x1xi32, #tpu.memory_space<vmem>>, vector<16x1xi32>
    %13 = tpu.iota {dimensions = array<i32: 1>} : vector<16x128xi32>
    %14 = vector.broadcast %12 : vector<16x1xi32> to vector<16x128xi32>
    %15 = arith.cmpi eq, %13, %14 : vector<16x128xi32>
    %cst_6 = arith.constant 1.000000e+00 : f32
    %cst_7 = arith.constant 0.000000e+00 : f32
    %16 = vector.broadcast %cst_6 : f32 to vector<16x128xf32>
    %17 = vector.broadcast %cst_7 : f32 to vector<16x128xf32>
    %18 = arith.select %15, %16, %17 : vector<16x128xi1>, vector<16x128xf32>
    %cst_8 = arith.constant 5.000000e-01 : f32
    %19 = vector.broadcast %cst_8 : f32 to vector<16x128xf32>
    %20 = arith.mulf %19, %11 : vector<16x128xf32>
    %cst_9 = arith.constant 5.000000e-01 : f32
    %21 = vector.broadcast %cst_9 : f32 to vector<16x128xf32>
    %22 = arith.mulf %21, %18 : vector<16x128xf32>
    %23 = arith.addf %20, %22 : vector<16x128xf32>
    %24 = arith.mulf %23, %10 : vector<16x128xf32>
    %cst_10 = arith.constant dense<0.000000e+00> : vector<16xf32>
    %25 = vector.multi_reduction <add>, %24, %cst_10 [1] : vector<16x128xf32> to vector<16xf32>
    %26 = vector.shape_cast %25 : vector<16xf32> to vector<16x1xf32>
    %c16_i32 = arith.constant 16 : i32
    %27 = arith.muli %arg0, %c16_i32 : i32
    %28 = tpu.iota {dimensions = array<i32: 0>} : vector<16x1xi32>
    %29 = vector.broadcast %27 : i32 to vector<16x1xi32>
    %30 = arith.addi %29, %28 : vector<16x1xi32>
    %c12_i32 = arith.constant 12 : i32
    %31 = vector.broadcast %c12_i32 : i32 to vector<16x1xi32>
    %32 = arith.cmpi slt, %30, %31 : vector<16x1xi32>
    %cst_11 = arith.constant 0.000000e+00 : f32
    %33 = vector.broadcast %cst_11 : f32 to vector<16x1xf32>
    %34 = arith.select %32, %26, %33 : vector<16x1xi1>, vector<16x1xf32>
    %c0_12 = arith.constant 0 : index
    %c0_13 = arith.constant 0 : index
    %35 = vector.load %arg4[%c0_12, %c0_13] : memref<16x1xf32, #tpu.memory_space<vmem>>, vector<16x1xf32>
    tpu.vector_store %arg4[%c0_12, %c0_13], %34 {strides = array<i32>} : memref<16x1xf32, #tpu.memory_space<vmem>>, vector<16x1xf32>,
    return
  }
  func.func @transform_0(%arg0: i32) -> (i32, i32) {
    %c0_i32 = arith.constant 0 : i32
    %c0_i32_0 = arith.constant 0 : i32
    return %arg0, %c0_i32 : i32, i32
  }
  func.func @transform_1(%arg0: i32) -> (i32, i32) {
    %c0_i32 = arith.constant 0 : i32
    %c0_i32_0 = arith.constant 0 : i32
    return %arg0, %c0_i32 : i32, i32
  }
  func.func @transform_2(%arg0: i32) -> (i32, i32) {
    %c0_i32 = arith.constant 0 : i32
    %c0_i32_0 = arith.constant 0 : i32
    return %arg0, %c0_i32 : i32, i32
  }
  func.func @transform_3(%arg0: i32) -> (i32, i32) {
    %c0_i32 = arith.constant 0 : i32
    %c0_i32_0 = arith.constant 0 : i32
    return %arg0, %c0_i32 : i32, i32
  }
}

</mosaic_0001>

<bundles_post_ra>
// kernel: tpu_custom_call.1
= control target key start
LH: loop header
LB: loop body
LE: loop exit
PB: predicated region body
PF: predicated region fallthrough
CT: control target
= control target key end

     0   :  { %8 = vsyncpa [#allocation3], 0  ;;  %s140_s15 = smov [#allocation2]   ;;  %s141_s17 = smov 128   ;;  %s186_s0 = inlined_call_operand.vmem [shape: f32[16,128], index: 0, kind: input, shape index: {}]   ;;  %s187_s1 = inlined_call_operand.hbm [shape: f32[16,128], index: 1, kind: input, shape index: {}]   ;;  %s188_s2 = inlined_call_operand.vmem [shape: s32[16,1], index: 2, kind: input, shape index: {}]   ;;  %s189_s3 = inlined_call_operand.vmem [shape: f32[16,1], index: 3, kind: output, shape index: {}]  }
   0x1   :  { %s15_s14 = sshll.u32 %s187_s1, 4  ;;  %s17_s16 = sshll.u32 %s140_s15, 4  ;;  %s16_s14 = int_to_ptr.hbm [resolvable:$true] %s15_s14  ;;  %s18_s16 = int_to_ptr.vmem [resolvable:$true] %s17_s16 }
   0x2   :  { %s142_s18 = smov 8  }
   0x3   :  { %23 = dma.hbm_to_vmem [thread:$0]  %s16_s14, 256, %s18_s16, [#allocation3], %s141_s17, %s141_s17, %s142_s18  }
   0x4   :  { %138 = dma.done.wait [#allocation3], 256  }
   0x5   :  { %139 = vsyncadd [#allocation3], 4294967040  ;;  %v31_v0 = vld [vmem:[%s186_s0 + $0x8] sm:$0xff]  ;;  %v30_v1 = vld [vmem:[%s186_s0] sm:$0xff]  ;;  %v143_v3 = vmov 0   ;;  %v56_v13 = vlaneseq  ;;  %v144_v17 = vmov 0.0  }
   0x6   :  { %34 = vmax.xlane.f32.xlu0 %v31_v0  ;;  %v55_v2 = vld [vmem:[%s188_s2 + $0x8] sm:$0xff]  ;;  %104 = vset.pattern.permute.xlu2 %v143_v3  ;;  %v54_v4 = vld [vmem:[%s188_s2] sm:$0xff]  ;;  %vm91_vm3 = vcmask 7168  }
   0x7   :  { %105 = vset.pattern.permute.xlu0 %v143_v3  ;;  %62 = vperm.xlu2 %104, %v55_v2   ;;  %v57_v14 = vand.u32 127, %v56_v13  ;;  %v53_v19 = vld [vmem:[#allocation2 + $0x8] sm:$0xff]  ;;  %v52_v29 = vld [vmem:[#allocation2] sm:$0xff]  ;;  %v82_v38 = vshrl.u32 %v56_v13, 7 }
   0x8   :  { %v69_v21 = vmul.f32 0.5, %v53_v19  ;;  %v68_v32 = vmul.f32 0.5, %v52_v29 }
   0x9   :  { %v83_v39 = vadd.s32 8, %v82_v38 }
   0xb   :  { %vm88_vm2 = vcmp.lt.s32.totalorder %v83_v39, 12 }
   0xe   :  { %32 = vmax.xlane.f32.xlu0 %v30_v1 }
   0xf   :  { %59 = vperm.xlu2 %104, %v54_v4  }
  0x61   :  { %v63_v15 = vpop.permute.xlu2 %62 }
  0x62   :  { %vm65_vm0 = vcmp.eq.s32.totalorder %v57_v14, %v63_v15 }
  0x63   :  { %v67_v18 = vsel %vm65_vm0, 1.0, %v144_v17 }
  0x64   :  { %v71_v20 = vmul.f32 0.5, %v67_v18 }
  0x66   :  { %v73_v26 = vadd.f32 %v71_v20, %v69_v21 }
  0x69   :  { %v60_v22 = vpop.permute.xlu2 %59 }
  0x6a   :  { %vm64_vm1 = vcmp.eq.s32.totalorder %v57_v14, %v60_v22 }
  0x6b   :  { %v66_v28 = vsel %vm64_vm1, 1.0, %v144_v17 }
  0x6c   :  { %v70_v31 = vmul.f32 0.5, %v66_v28 }
  0x6e   :  { %v72_v36 = vadd.f32 %v70_v31, %v68_v32 }
  0x79   :  { %v35_v5 = vpop.xlane.xlu0 %34 }
  0x7a   :  { %v37_v6 = vsub.f32 %v31_v0, %v35_v5 }
  0x7c   :  { %v40_v7 = vmul.f32 1.442695, %v37_v6 }
  0x7e   :  { %106 = vpow2.f32 %v40_v7 }
  0x81   :  { %v33_v8 = vpop.xlane.xlu0 %32 }
  0x82   :  { %v36_v9 = vsub.f32 %v30_v1, %v33_v8 }
  0x84   :  { %v107_v10 = vpop.eup %106  ;;  %v38_v11 = vmul.f32 1.442695, %v36_v9 }
  0x85   :  { %44 = vadd.xlane.f32.xlu1 %v107_v10 }
  0x86   :  { %108 = vpow2.f32 %v38_v11 }
  0x8c   :  { %v109_v12 = vpop.eup %108 }
  0x8d   :  { %42 = vadd.xlane.f32.xlu1 %v109_v12 }
  0xf8   :  { %v45_v16 = vpop.xlane.xlu1 %44 }
  0xf9   :  { %110 = vlog2.f32 %v45_v16 }
  0xff   :  { %v111_v23 = vpop.eup %110 }
 0x100   :  { %v49_v24 = vmul.f32 0.6931472, %v111_v23  ;;  %v43_v25 = vpop.xlane.xlu1 %42 }
 0x101   :  { %112 = vlog2.f32 %v43_v25 }
 0x102   :  { %v51_v27 = vsub.f32 %v49_v24, %v37_v6 }
 0x104   :  { %v75_v30 = vmul.f32 %v73_v26, %v51_v27 }
 0x106   :  { %78 = vadd.xlane.f32.xlu0 %v75_v30 }
 0x107   :  { %v113_v33 = vpop.eup %112 }
 0x108   :  { %v47_v34 = vmul.f32 0.6931472, %v113_v33 }
 0x10a   :  { %v50_v35 = vsub.f32 %v47_v34, %v36_v9 }
 0x10c   :  { %v74_v37 = vmul.f32 %v72_v36, %v50_v35 }
 0x10e   :  { %76 = vadd.xlane.f32.xlu1 %v74_v37 }
 0x179   :  { %v79_v40 = vpop.xlane.xlu0 %78 }
 0x17a   :  { %v90_v41 = vsel %vm88_vm2, %v79_v40, 0.0 }
 0x17b   :  { %93 = vst.msk [vmem:[%s189_s3 + $0x8] sm:$0xff] %vm91_vm3, %v90_v41 }
 0x181   :  { %v77_v42 = vpop.xlane.xlu1 %76 }
 0x182   :  { %92 = vst.msk [vmem:[%s189_s3] sm:$0xff] %vm91_vm3, %v77_v42 }
 0x183   :  { %98 = vsyncpa [#allocation3], 1 }

</bundles_post_ra>
